<compile_context>
chip_gen: v5e
topology: v5e:2x2
jax: 0.10.0
libtpu: 0.0.40
codegen_flags: <defaults>
</compile_context>

<pallas_src>
import functools
import math

import jax
import jax.numpy as jnp
from jax.experimental import pallas as pl
from jax.experimental.pallas import tpu as pltpu


# ----------------------------------------------------------------------------
# Buffer setup: sinusoidal positional-encoding table (mirrors module __init__).
# ----------------------------------------------------------------------------
def build_pe_table(max_len: int, d_model: int, scale_factor: float = 1.0) -> jnp.ndarray:
    assert d_model % 2 == 0, "d_model must be even for the sin/cos interleave"
    position = jnp.arange(max_len, dtype=jnp.float32)[:, None]                  # (max_len, 1)
    div_term = jnp.exp(
        jnp.arange(0, d_model, 2, dtype=jnp.float32) * (-math.log(10000.0) / d_model)
    )                                                                            # (d_model/2,)
    pe = jnp.zeros((max_len, d_model), dtype=jnp.float32)
    pe = pe.at[:, 0::2].set(jnp.sin(position * div_term))
    pe = pe.at[:, 1::2].set(jnp.cos(position * div_term))
    return scale_factor * pe                                                     # (max_len, d_model)


# ----------------------------------------------------------------------------
# Kernel: one lane-dense vadd per vreg.
#   x_ref : (ts, reps * D_eff)  streamed tile of x
#   pe_ref: (S_pad, D_eff)      resident f32 PE table (constant block index)
#   o_ref : (ts, reps * D_eff)  output tile
# ----------------------------------------------------------------------------
def _pe_add_kernel(x_ref, pe_ref, o_ref, *, reps: int):
    ts = x_ref.shape[0]
    start = pl.multiple_of(pl.program_id(0) * ts, ts)
    pe = pe_ref[pl.ds(start, ts), :]                      # (ts, D_eff), f32
    if reps > 1:
        pe = jnp.tile(pe, (1, reps))                      # broadcast across batch in VMEM
    o_ref[...] = (x_ref[...].astype(jnp.float32) + pe).astype(o_ref.dtype)


def _default_vmem_limit_bytes() -> int:
    """v7x has 64 MiB VMEM per TensorCore (stay <= 48 MiB); v4/v5e/v6e have 128 MiB."""
    try:
        kind = jax.devices()[0].device_kind.lower()
    except Exception:  # pragma: no cover - be conservative if query fails
        kind = ""
    if ("v4" in kind) or ("v5" in kind) or ("v6" in kind):
        return 96 * 1024 * 1024
    return 48 * 1024 * 1024


def _round_up(n: int, m: int) -> int:
    return pl.cdiv(n, m) * m


def fixed_positional_encoding(
    x: jnp.ndarray,
    pe_table: jnp.ndarray,
    *,
    max_rows_per_tile: int = 2048,
    min_pallas_bytes: int = 1 << 20,
    vmem_limit_bytes: int | None = None,
) -> jnp.ndarray:
    """out = x + pe[:S] with x of shape (S, B, D); dropout is identity (eval mode)."""
    S, B, D = x.shape
    assert pe_table.shape[0] >= S and pe_table.shape[1] == D
    itemsize = jnp.dtype(x.dtype).itemsize
    x_bytes = S * B * D * itemsize

    # Tiny inputs: let XLA fuse a single vadd; pallas_call overhead would dominate.
    if x_bytes < min_pallas_bytes:
        pe = pe_table[:S].astype(jnp.float32)[:, None, :]
        return (x.astype(jnp.float32) + pe).astype(x.dtype)

    # Lane-dense 2-D view (S_eff, reps * D_eff).  For B == 1 with D < 128 fold
    # consecutive sequence rows into the lane axis to keep stores unmasked.
    S_eff, D_eff, reps = S, D, B
    if B == 1 and D % 128 != 0 and 128 % D == 0 and S % (128 // D) == 0:
        fold = 128 // D
        S_eff, D_eff, reps = S // fold, D * fold, 1
    BD_eff = reps * D_eff

    x2 = x.reshape(S_eff, BD_eff)                                   # free reshape
    pe_flat = pe_table[:S].astype(jnp.float32).reshape(S_eff, D_eff)  # tiny f32 table

    if vmem_limit_bytes is None:
        vmem_limit_bytes = _default_vmem_limit_bytes()

    row_align = max(8, 32 // itemsize)  # 8 for f32, 16 for bf16, 32 for int8

    # VMEM budget: x + out tiles double-buffered (4 live tiles) plus the resident
    # f32 PE table (counted twice -- we do not rely on pl.Buffered(1)).
    budget = int(0.75 * vmem_limit_bytes)
    pe_resident_bytes = 2 * _round_up(S_eff, row_align) * D_eff * 4
    ts_budget = (budget - pe_resident_bytes) // (4 * BD_eff * itemsize)
    ts_budget = max(row_align, (ts_budget // row_align) * row_align)

    # Keep >= 2 grid steps for megacore (v7x) / streamed DMA on large inputs;
    # a single step is fine below ~1 MiB where per-step overhead would dominate.
    if x_bytes >= 8 * (1 << 20):
        desired_steps = 8
    elif x_bytes >= (1 << 20):
        desired_steps = 2
    else:
        desired_steps = 1
    ts_steps = _round_up(pl.cdiv(S_eff, desired_steps), row_align)

    max_rows = max(row_align, (max_rows_per_tile // row_align) * row_align)
    ts = min(ts_budget, ts_steps, max_rows, _round_up(S_eff, row_align))
    ts = max(ts, row_align)

    grid = pl.cdiv(S_eff, ts)

    # Pad only the tiny PE table so the in-kernel pl.ds slice on the ragged last
    # grid step never reads past its end (VMEM refs have no bounds check).
    s_pad_pe = grid * ts
    if pe_flat.shape[0] != s_pad_pe:
        pe_flat = jnp.pad(pe_flat, ((0, s_pad_pe - pe_flat.shape[0]), (0, 0)))

    out2 = pl.pallas_call(
        functools.partial(_pe_add_kernel, reps=reps),
        out_shape=jax.ShapeDtypeStruct((S_eff, BD_eff), x.dtype),
        grid_spec=pltpu.PrefetchScalarGridSpec(
            num_scalar_prefetch=0,
            grid=(grid,),
            in_specs=[
                pl.BlockSpec((ts, BD_eff), lambda i: (i, 0)),        # x tile (streamed)
                pl.BlockSpec((s_pad_pe, D_eff), lambda i: (0, 0)),   # PE table (resident)
            ],
            out_specs=pl.BlockSpec((ts, BD_eff), lambda i: (i, 0)),
        ),
        compiler_params=pltpu.CompilerParams(
            dimension_semantics=("parallel",),
            vmem_limit_bytes=vmem_limit_bytes,
        ),
    )(x2, pe_flat)

    return out2.reshape(S, B, D)


if __name__ == "__main__":
    d_model = 64
    max_len = 1024
    scale_factor = 1.0

    pe_table = build_pe_table(max_len, d_model, scale_factor)
    key = jax.random.PRNGKey(0)

    def _check(S, B, **kw):
        k = jax.random.fold_in(key, S * 1000 + B)
        x = jax.random.normal(k, (S, B, d_model), dtype=jnp.float32)
        out = jax.block_until_ready(fixed_positional_encoding(x, pe_table, **kw))
        ref = x + pe_table[:S][:, None, :]
        assert out.shape == x.shape and out.dtype == x.dtype
        assert jnp.allclose(out, ref, atol=1e-6, rtol=1e-6), f"mismatch S={S} B={B}"

    # Primary small case from the module (seq=8, batch=2, d_model=64): XLA fast path.
    _check(8, 2)
    # Same small shape, forced through the Pallas kernel (single grid step, B*D=128).
    _check(8, 2, min_pallas_bytes=0)
    # Multi-step grid with a ragged last block (S % ts != 0) + resident-PE pl.ds path.
    _check(40, 2, min_pallas_bytes=0, max_rows_per_tile=16)
    # B*D not a multiple of 128 (masked-store path) -- correctness only.
    _check(24, 3, min_pallas_bytes=0, max_rows_per_tile=8)
    # B == 1 fold-into-lanes path (D=64 -> two rows folded to 128 lanes).
    _check(16, 1, min_pallas_bytes=0)
    # Larger input that naturally takes the Pallas path (>= 1 MiB, >= 2 grid steps).
    _check(512, 16)

    print("KERNEL_OK")
</pallas_src>

<mosaic_0001>
module attributes {stable_mosaic.version = 11 : i64} {
  func.func @_pe_add_kernel(%arg0: i32, %arg1: memref<8x128xf32, #tpu.memory_space<vmem>>, %arg2: memref<8x64xf32, #tpu.memory_space<vmem>>, %arg3: memref<8x128xf32, #tpu.memory_space<vmem>>) attributes {dimension_semantics = [#tpu.dimension_semantics<parallel>], iteration_bounds = array<i64: 1>, scalar_prefetch = 0 : i64, scratch_operands = 0 : i64, tpu.core_type = #tpu.core_type<tc>, window_params = [{transform_indices = @transform_0, window_bounds = array<i64: 8, 128>}, {pipeline_mode = #tpu.pipeline_mode<synchronous>, transform_indices = @transform_1, window_bounds = array<i64: 8, 64>}, {transform_indices = @transform_2, window_bounds = array<i64: 8, 128>}]} {
    %c8_i32 = arith.constant 8 : i32
    %0 = arith.muli %arg0, %c8_i32 : i32
    %1 = tpu.assume_multiple %0, 8 : i32
    %2 = arith.index_cast %1 : i32 to index
    %c0 = arith.constant 0 : index
    %3 = vector.load %arg2[%2, %c0] : memref<8x64xf32, #tpu.memory_space<vmem>>, vector<8x64xf32>
    %4 = tpu.concatenate %3, %3 in 1 : vector<8x64xf32>, vector<8x64xf32> -> vector<8x128xf32>
    %c0_0 = arith.constant 0 : index
    %c0_1 = arith.constant 0 : index
    %5 = vector.load %arg1[%c0_0, %c0_1] : memref<8x128xf32, #tpu.memory_space<vmem>>, vector<8x128xf32>
    %6 = arith.addf %5, %4 : vector<8x128xf32>
    %c0_2 = arith.constant 0 : index
    %c0_3 = arith.constant 0 : index
    %7 = vector.load %arg3[%c0_2, %c0_3] : memref<8x128xf32, #tpu.memory_space<vmem>>, vector<8x128xf32>
    tpu.vector_store %arg3[%c0_2, %c0_3], %6 {strides = array<i32>} : memref<8x128xf32, #tpu.memory_space<vmem>>, vector<8x128xf32>,
    return
  }
  func.func @transform_0(%arg0: i32) -> (i32, i32) {
    %c0_i32 = arith.constant 0 : i32
    %c0_i32_0 = arith.constant 0 : i32
    return %arg0, %c0_i32 : i32, i32
  }
  func.func @transform_1(%arg0: i32) -> (i32, i32) {
    %c0_i32 = arith.constant 0 : i32
    %c0_i32_0 = arith.constant 0 : i32
    %c0_i32_1 = arith.constant 0 : i32
    return %c0_i32, %c0_i32_0 : i32, i32
  }
  func.func @transform_2(%arg0: i32) -> (i32, i32) {
    %c0_i32 = arith.constant 0 : i32
    %c0_i32_0 = arith.constant 0 : i32
    return %arg0, %c0_i32 : i32, i32
  }
}

</mosaic_0001>

<bundles_post_ra>
// kernel: tpu_custom_call.1
= control target key start
LH: loop header
LB: loop body
LE: loop exit
PB: predicated region body
PF: predicated region fallthrough
CT: control target
= control target key end

     0   :  { %7 = vsyncpa [#allocation3], 0  ;;  %s180_s0 = inlined_call_operand.hbm [shape: f32[8,128], index: 0, kind: input, shape index: {}]   ;;  %s181_s1 = inlined_call_operand.hbm [shape: f32[8,64], index: 1, kind: input, shape index: {}]   ;;  %s182_s2 = inlined_call_operand.hbm [shape: f32[8,128], index: 2, kind: output, shape index: {}]  }
   0x1   :  { %8 = vsyncpa [#allocation6], 0 }
   0x2   :  { %9 = vsyncpa [#allocation4], 0  ;;  %s15_s11 = sshll.u32 %s180_s0, 4  ;;  %s152_s12 = smov [#allocation2]   ;;  %s16_s11 = int_to_ptr.hbm [resolvable:$true] %s15_s11 }
   0x3   :  { %s17_s13 = sshll.u32 %s152_s12, 4  ;;  %s26_s16 = sshll.u32 %s181_s1, 4  ;;  %s18_s13 = int_to_ptr.vmem [resolvable:$true] %s17_s13  ;;  %s27_s16 = int_to_ptr.hbm [resolvable:$true] %s26_s16 }
   0x4   :  { %20 = dma.hbm_to_vmem [thread:$0]  %s16_s11, 128, %s18_s13, [#allocation3]  }
   0x5   :  { %s153_s17 = smov [#allocation5]  }
   0x6   :  { %s28_s18 = sshll.u32 %s153_s17, 4  ;;  %s29_s18 = int_to_ptr.vmem [resolvable:$true] %s28_s18 }
   0x7   :  { %31 = dma.hbm_to_vmem [thread:$0]  %s27_s16, 128, %s29_s18, [#allocation6]  }
   0x8   :  { %146 = dma.done.wait [#allocation3], 128  }
   0x9   :  { %147 = vsyncadd [#allocation3], 4294967168 }
   0xa   :  { %148 = dma.done.wait [#allocation6], 128  }
   0xb   :  { %149 = vsyncadd [#allocation6], 4294967168  ;;  %v42_v0 = vld [vmem:[#allocation5] sm:$0xff]  ;;  %s154_s0 = smov 64   ;;  %vm47_vm0 = vcmask 523264   ;;  %v49_v1 = vld [vmem:[#allocation2] sm:$0xff] }
   0xc   :  { %44 = vrot.lane.b32.xlu0 %v42_v0, %s154_s0  ;;  %s155_s19 = smov [#allocation7]   ;;  %s59_s1 = sshll.u32 %s182_s2, 4  ;;  %s60_s1 = int_to_ptr.hbm [resolvable:$true] %s59_s1 }
   0xd   :  { %s57_s20 = sshll.u32 %s155_s19, 4  ;;  %s58_s20 = int_to_ptr.vmem [resolvable:$true] %s57_s20 }
  0x7e   :  { %v45_v2 = vpop.permute.xlu0 %44 }
  0x7f   :  { %v48_v3 = vsel %vm47_vm0, %v42_v0, %v45_v2 }
  0x80   :  { %v50_v4 = vadd.f32 %v49_v1, %v48_v3 }
  0x82   :  { %51 = vst [vmem:[#allocation7] sm:$0xff] %v50_v4 }
  0x83   :  { %62 = dma.vmem_to_hbm [thread:$0]  %s58_s20, 128, %s60_s1, [#allocation4]  }
  0x84   :  { %150 = dma.done.wait [#allocation4], 128  }
  0x85   :  { %151 = vsyncadd [#allocation4], 4294967168 }
  0x86   :  { %67 = vsyncpa [#allocation3], 1 }
  0x87   :  { %68 = vsyncpa [#allocation6], 1 }
  0x88   :  { %69 = vsyncpa [#allocation4], 1 }

</bundles_post_ra>
